<compile_context>
chip_gen: v7x
topology: tpu7x:2x2x1
jax: 0.10.0
libtpu: 0.0.40
codegen_flags: <defaults>
</compile_context>

<pallas_src>
import functools

import jax
import jax.numpy as jnp
from jax.experimental import pallas as pl
from jax.experimental.pallas import tpu as pltpu

LANE = 128


# ----------------------------------------------------------------------------
# Activation handling (mirrors SparseAutoEncoder.activation_function)
# ----------------------------------------------------------------------------
def _apply_activation(h, name):
    if name == "linear":
        return h
    elif name == "sigmoid":
        return jax.nn.sigmoid(h)
    elif name == "relu":
        return jnp.maximum(h, 0.0)
    elif name == "tanh":
        return jnp.tanh(h)
    elif name == "elu":
        return jnp.where(h > 0, h, jnp.expm1(jnp.minimum(h, 0.0)))
    elif name == "rrelu":
        # TODO(synk): training-mode rrelu is stochastic; this is eval-mode
        # F.rrelu == leaky_relu with slope (lower + upper) / 2 = (1/8 + 1/3)/2.
        slope = (1.0 / 8.0 + 1.0 / 3.0) / 2.0
        return jnp.where(h >= 0, h, slope * h)
    else:
        raise NotImplementedError(name)


def activation_vec(layer_vec, activation):
    # ['linear'] + (len-3)*[activation] + ['linear']  (same as the torch code)
    return ["linear"] + (len(layer_vec) - 3) * [activation] + ["linear"]


# ----------------------------------------------------------------------------
# Fused encode+decode Pallas kernel (data layout: (features, batch))
# ----------------------------------------------------------------------------
def _make_fused_sae_kernel(n_enc, n_dec, acts, compute_dtype):
    """refs = (z_t, w_e0, b_e0, ..., w_dN, b_dN, z_rec_t, x_lat_t)."""

    def _layer(h, w_ref, b_ref, act_name):
        # h: (in_f, tb)   w: (out_f, in_f)   b: (out_f, 1)
        acc = jnp.dot(w_ref[...], h, preferred_element_type=jnp.float32)
        acc = acc + b_ref[...].astype(jnp.float32)          # broadcast over lanes
        acc = _apply_activation(acc, act_name)
        return acc.astype(compute_dtype)

    def kernel(*refs):
        z_ref = refs[0]
        param_refs = refs[1:1 + 2 * (n_enc + n_dec)]
        z_rec_ref = refs[-2]
        x_lat_ref = refs[-1]

        h = z_ref[...]
        # encode
        for i in range(n_enc):
            h = _layer(h, param_refs[2 * i], param_refs[2 * i + 1], acts[i])
        x_lat_ref[...] = h.astype(x_lat_ref.dtype)
        # decode (PyTorch decode() also indexes activation_vec from 0)
        for i in range(n_dec):
            h = _layer(h, param_refs[2 * (n_enc + i)],
                       param_refs[2 * (n_enc + i) + 1], acts[i])
        z_rec_ref[...] = h.astype(z_rec_ref.dtype)

    return kernel


def _pick_batch_tile(batch, batch_tile):
    """Lane-axis tile: multiple of 128, divides batch exactly (no pad/slice),
    and keeps >=2 grid steps when possible so v7x's 2 TCs both get work."""
    if batch % LANE != 0:
        return batch, 1                       # ragged/tiny batch: one full block
    tb = max(LANE, min((batch_tile // LANE) * LANE, batch))
    while batch % tb:
        tb -= LANE
    if batch // tb == 1 and batch % (2 * LANE) == 0:
        tb = batch // 2                       # give the second TensorCore work
    return tb, batch // tb


def _pick_vmem_limit():
    try:
        cap = pltpu.get_tpu_info().vmem_capacity_bytes
        return int(min(cap * 3 // 4, 100 * 1024 * 1024))
    except Exception:
        return 48 * 1024 * 1024               # safe default for 64 MiB-VMEM v7x


def sae_forward(params, z, layer_vec, activation, batch_tile=1024):
    """Fused Pallas forward: returns (z_reconst, x_latent) with PyTorch shapes.

    params['enc'][k] / params['dec'][k] = (W, b) with W in PyTorch-native
    (out_features, in_features) layout and b of shape (out_features,).
    """
    acts = tuple(activation_vec(layer_vec, activation))
    enc, dec = params["enc"], params["dec"]
    batch, in_dim = z.shape
    latent_dim = layer_vec[-1]

    tb, n_steps = _pick_batch_tile(batch, batch_tile)

    # Batch on the lane axis: (in_dim, batch). Wrapper-side transposes of these
    # tiny slabs are layout plumbing only.
    z_t = z.T

    args = [z_t]
    in_specs = [pl.BlockSpec((in_dim, tb), lambda i: (0, i))]
    for (w, b) in list(enc) + list(dec):
        b_col = b.reshape(-1, 1)              # (out_f, 1): broadcasts over lanes
        args.extend([w, b_col])
        # Constant index_map -> weights/biases stay VMEM-resident across steps.
        in_specs.append(pl.BlockSpec(w.shape, lambda i: (0, 0)))
        in_specs.append(pl.BlockSpec(b_col.shape, lambda i: (0, 0)))

    kernel = _make_fused_sae_kernel(len(enc), len(dec), acts, z.dtype)

    z_rec_t, x_lat_t = pl.pallas_call(
        kernel,
        grid=(n_steps,),
        in_specs=in_specs,
        out_specs=(
            pl.BlockSpec((in_dim, tb), lambda i: (0, i)),
            pl.BlockSpec((latent_dim, tb), lambda i: (0, i)),
        ),
        out_shape=(
            jax.ShapeDtypeStruct((in_dim, batch), z.dtype),
            jax.ShapeDtypeStruct((latent_dim, batch), z.dtype),
        ),
        compiler_params=pltpu.CompilerParams(
            dimension_semantics=("parallel",),
            vmem_limit_bytes=_pick_vmem_limit(),
        ),
    )(*args)

    return z_rec_t.T, x_lat_t.T


# ----------------------------------------------------------------------------
# Parameter init (nn.Linear default U(-1/sqrt(in), 1/sqrt(in)); weights kept
# in PyTorch-native (out, in) layout since the kernel computes W @ h)
# ----------------------------------------------------------------------------
def init_linear(key, in_f, out_f, dtype):
    kw, kb = jax.random.split(key)
    bound = 1.0 / (in_f ** 0.5)
    w = jax.random.uniform(kw, (out_f, in_f), dtype, -bound, bound)
    b = jax.random.uniform(kb, (out_f,), dtype, -bound, bound)
    return w, b


def init_sae_params(key, layer_vec, dtype):
    steps = len(layer_vec) - 1
    keys = jax.random.split(key, 2 * steps)
    enc = [init_linear(keys[k], layer_vec[k], layer_vec[k + 1], dtype)
           for k in range(steps)]
    dec = [init_linear(keys[steps + k], layer_vec[steps - k], layer_vec[steps - k - 1], dtype)
           for k in range(steps)]
    return {"enc": enc, "dec": dec}


# ----------------------------------------------------------------------------
# Pure-JAX reference (PyTorch semantics) for correctness check
# ----------------------------------------------------------------------------
def _mlp_ref(x, chain, acts):
    h = x
    for (w, b), a in zip(chain, acts):
        h = h @ w.T + b
        h = _apply_activation(h, a)
    return h


def sae_forward_ref(params, z, layer_vec, activation):
    acts = activation_vec(layer_vec, activation)
    x = _mlp_ref(z, params["enc"], acts)
    z_rec = _mlp_ref(x, params["dec"], acts)
    return z_rec, x


# ----------------------------------------------------------------------------
# Main
# ----------------------------------------------------------------------------
if __name__ == "__main__":
    layer_vec = [16, 32, 16, 4]
    activation = "tanh"
    dtype = jnp.float32
    batch = 512            # -> 2 lane-dense grid steps of 256 (both v7x TCs busy)
    batch_tile = 1024

    key = jax.random.PRNGKey(0)
    k_p, k_z = jax.random.split(key)
    params = init_sae_params(k_p, layer_vec, dtype)
    z = jax.random.normal(k_z, (batch, layer_vec[0]), dtype)

    fwd = jax.jit(functools.partial(
        sae_forward, layer_vec=layer_vec, activation=activation,
        batch_tile=batch_tile))
    z_reconst, x_latent = fwd(params, z)
    jax.block_until_ready((z_reconst, x_latent))

    # Correctness vs pure-JAX reference of the PyTorch forward semantics.
    z_ref, x_ref = sae_forward_ref(params, z, layer_vec, activation)
    assert z_reconst.shape == (batch, layer_vec[0])
    assert x_latent.shape == (batch, layer_vec[-1])
    assert jnp.allclose(x_latent, x_ref, atol=1e-5, rtol=1e-5)
    assert jnp.allclose(z_reconst, z_ref, atol=1e-5, rtol=1e-5)

    print("KERNEL_OK")
</pallas_src>

<mosaic_0001>
module attributes {stable_mosaic.version = 11 : i64} {
  func.func @kernel(%arg0: i32, %arg1: memref<16x256xf32, #tpu.memory_space<vmem>>, %arg2: memref<32x16xf32, #tpu.memory_space<vmem>>, %arg3: memref<32x1xf32, #tpu.memory_space<vmem>>, %arg4: memref<16x32xf32, #tpu.memory_space<vmem>>, %arg5: memref<16x1xf32, #tpu.memory_space<vmem>>, %arg6: memref<4x16xf32, #tpu.memory_space<vmem>>, %arg7: memref<4x1xf32, #tpu.memory_space<vmem>>, %arg8: memref<16x4xf32, #tpu.memory_space<vmem>>, %arg9: memref<16x1xf32, #tpu.memory_space<vmem>>, %arg10: memref<32x16xf32, #tpu.memory_space<vmem>>, %arg11: memref<32x1xf32, #tpu.memory_space<vmem>>, %arg12: memref<16x32xf32, #tpu.memory_space<vmem>>, %arg13: memref<16x1xf32, #tpu.memory_space<vmem>>, %arg14: memref<16x256xf32, #tpu.memory_space<vmem>>, %arg15: memref<4x256xf32, #tpu.memory_space<vmem>>) attributes {dimension_semantics = [#tpu.dimension_semantics<parallel>], iteration_bounds = array<i64: 2>, scalar_prefetch = 0 : i64, scratch_operands = 0 : i64, tpu.core_type = #tpu.core_type<tc>, window_params = [{transform_indices = @transform_0, window_bounds = array<i64: 16, 256>}, {pipeline_mode = #tpu.pipeline_mode<synchronous>, transform_indices = @transform_1, window_bounds = array<i64: 32, 16>}, {pipeline_mode = #tpu.pipeline_mode<synchronous>, transform_indices = @transform_2, window_bounds = array<i64: 32, 1>}, {pipeline_mode = #tpu.pipeline_mode<synchronous>, transform_indices = @transform_3, window_bounds = array<i64: 16, 32>}, {pipeline_mode = #tpu.pipeline_mode<synchronous>, transform_indices = @transform_4, window_bounds = array<i64: 16, 1>}, {pipeline_mode = #tpu.pipeline_mode<synchronous>, transform_indices = @transform_5, window_bounds = array<i64: 4, 16>}, {pipeline_mode = #tpu.pipeline_mode<synchronous>, transform_indices = @transform_6, window_bounds = array<i64: 4, 1>}, {pipeline_mode = #tpu.pipeline_mode<synchronous>, transform_indices = @transform_7, window_bounds = array<i64: 16, 4>}, {pipeline_mode = #tpu.pipeline_mode<synchronous>, transform_indices = @transform_8, window_bounds = array<i64: 16, 1>}, {pipeline_mode = #tpu.pipeline_mode<synchronous>, transform_indices = @transform_9, window_bounds = array<i64: 32, 16>}, {pipeline_mode = #tpu.pipeline_mode<synchronous>, transform_indices = @transform_10, window_bounds = array<i64: 32, 1>}, {pipeline_mode = #tpu.pipeline_mode<synchronous>, transform_indices = @transform_11, window_bounds = array<i64: 16, 32>}, {pipeline_mode = #tpu.pipeline_mode<synchronous>, transform_indices = @transform_12, window_bounds = array<i64: 16, 1>}, {transform_indices = @transform_13, window_bounds = array<i64: 16, 256>}, {transform_indices = @transform_14, window_bounds = array<i64: 4, 256>}]} {
    %c0 = arith.constant 0 : index
    %c0_0 = arith.constant 0 : index
    %0 = vector.load %arg1[%c0, %c0_0] : memref<16x256xf32, #tpu.memory_space<vmem>>, vector<16x256xf32>
    %c0_1 = arith.constant 0 : index
    %c0_2 = arith.constant 0 : index
    %1 = vector.load %arg2[%c0_1, %c0_2] : memref<32x16xf32, #tpu.memory_space<vmem>>, vector<32x16xf32>
    %cst = arith.constant dense<0.000000e+00> : vector<32x256xf32>
    %2 = tpu.matmul %1, %0, %cst {dimension_numbers = #tpu.dot_dimension_numbers<[1], [0], [0], [1], [0, 0, 1, 1], [], []>} : vector<32x16xf32>, vector<16x256xf32>, vector<32x256xf32> -> vector<32x256xf32>
    %c0_3 = arith.constant 0 : index
    %c0_4 = arith.constant 0 : index
    %3 = vector.load %arg3[%c0_3, %c0_4] : memref<32x1xf32, #tpu.memory_space<vmem>>, vector<32x1xf32>
    %4 = vector.broadcast %3 : vector<32x1xf32> to vector<32x256xf32>
    %5 = arith.addf %2, %4 : vector<32x256xf32>
    %c0_5 = arith.constant 0 : index
    %c0_6 = arith.constant 0 : index
    %6 = vector.load %arg4[%c0_5, %c0_6] : memref<16x32xf32, #tpu.memory_space<vmem>>, vector<16x32xf32>
    %cst_7 = arith.constant dense<0.000000e+00> : vector<16x256xf32>
    %7 = tpu.matmul %6, %5, %cst_7 {dimension_numbers = #tpu.dot_dimension_numbers<[1], [0], [0], [1], [0, 0, 1, 1], [], []>} : vector<16x32xf32>, vector<32x256xf32>, vector<16x256xf32> -> vector<16x256xf32>
    %c0_8 = arith.constant 0 : index
    %c0_9 = arith.constant 0 : index
    %8 = vector.load %arg5[%c0_8, %c0_9] : memref<16x1xf32, #tpu.memory_space<vmem>>, vector<16x1xf32>
    %9 = vector.broadcast %8 : vector<16x1xf32> to vector<16x256xf32>
    %10 = arith.addf %7, %9 : vector<16x256xf32>
    %11 = math.tanh %10 : vector<16x256xf32>
    %c0_10 = arith.constant 0 : index
    %c0_11 = arith.constant 0 : index
    %12 = vector.load %arg6[%c0_10, %c0_11] : memref<4x16xf32, #tpu.memory_space<vmem>>, vector<4x16xf32>
    %cst_12 = arith.constant dense<0.000000e+00> : vector<4x256xf32>
    %13 = tpu.matmul %12, %11, %cst_12 {dimension_numbers = #tpu.dot_dimension_numbers<[1], [0], [0], [1], [0, 0, 1, 1], [], []>} : vector<4x16xf32>, vector<16x256xf32>, vector<4x256xf32> -> vector<4x256xf32>
    %c0_13 = arith.constant 0 : index
    %c0_14 = arith.constant 0 : index
    %14 = vector.load %arg7[%c0_13, %c0_14] : memref<4x1xf32, #tpu.memory_space<vmem>>, vector<4x1xf32>
    %15 = vector.broadcast %14 : vector<4x1xf32> to vector<4x256xf32>
    %16 = arith.addf %13, %15 : vector<4x256xf32>
    %c0_15 = arith.constant 0 : index
    %c0_16 = arith.constant 0 : index
    %17 = vector.load %arg15[%c0_15, %c0_16] : memref<4x256xf32, #tpu.memory_space<vmem>>, vector<4x256xf32>
    tpu.vector_store %arg15[%c0_15, %c0_16], %16 {strides = array<i32>} : memref<4x256xf32, #tpu.memory_space<vmem>>, vector<4x256xf32>,
    %c0_17 = arith.constant 0 : index
    %c0_18 = arith.constant 0 : index
    %18 = vector.load %arg8[%c0_17, %c0_18] : memref<16x4xf32, #tpu.memory_space<vmem>>, vector<16x4xf32>
    %cst_19 = arith.constant dense<0.000000e+00> : vector<16x256xf32>
    %19 = tpu.matmul %18, %16, %cst_19 {dimension_numbers = #tpu.dot_dimension_numbers<[1], [0], [0], [1], [0, 0, 1, 1], [], []>} : vector<16x4xf32>, vector<4x256xf32>, vector<16x256xf32> -> vector<16x256xf32>
    %c0_20 = arith.constant 0 : index
    %c0_21 = arith.constant 0 : index
    %20 = vector.load %arg9[%c0_20, %c0_21] : memref<16x1xf32, #tpu.memory_space<vmem>>, vector<16x1xf32>
    %21 = vector.broadcast %20 : vector<16x1xf32> to vector<16x256xf32>
    %22 = arith.addf %19, %21 : vector<16x256xf32>
    %c0_22 = arith.constant 0 : index
    %c0_23 = arith.constant 0 : index
    %23 = vector.load %arg10[%c0_22, %c0_23] : memref<32x16xf32, #tpu.memory_space<vmem>>, vector<32x16xf32>
    %cst_24 = arith.constant dense<0.000000e+00> : vector<32x256xf32>
    %24 = tpu.matmul %23, %22, %cst_24 {dimension_numbers = #tpu.dot_dimension_numbers<[1], [0], [0], [1], [0, 0, 1, 1], [], []>} : vector<32x16xf32>, vector<16x256xf32>, vector<32x256xf32> -> vector<32x256xf32>
    %c0_25 = arith.constant 0 : index
    %c0_26 = arith.constant 0 : index
    %25 = vector.load %arg11[%c0_25, %c0_26] : memref<32x1xf32, #tpu.memory_space<vmem>>, vector<32x1xf32>
    %26 = vector.broadcast %25 : vector<32x1xf32> to vector<32x256xf32>
    %27 = arith.addf %24, %26 : vector<32x256xf32>
    %28 = math.tanh %27 : vector<32x256xf32>
    %c0_27 = arith.constant 0 : index
    %c0_28 = arith.constant 0 : index
    %29 = vector.load %arg12[%c0_27, %c0_28] : memref<16x32xf32, #tpu.memory_space<vmem>>, vector<16x32xf32>
    %cst_29 = arith.constant dense<0.000000e+00> : vector<16x256xf32>
    %30 = tpu.matmul %29, %28, %cst_29 {dimension_numbers = #tpu.dot_dimension_numbers<[1], [0], [0], [1], [0, 0, 1, 1], [], []>} : vector<16x32xf32>, vector<32x256xf32>, vector<16x256xf32> -> vector<16x256xf32>
    %c0_30 = arith.constant 0 : index
    %c0_31 = arith.constant 0 : index
    %31 = vector.load %arg13[%c0_30, %c0_31] : memref<16x1xf32, #tpu.memory_space<vmem>>, vector<16x1xf32>
    %32 = vector.broadcast %31 : vector<16x1xf32> to vector<16x256xf32>
    %33 = arith.addf %30, %32 : vector<16x256xf32>
    %c0_32 = arith.constant 0 : index
    %c0_33 = arith.constant 0 : index
    %34 = vector.load %arg14[%c0_32, %c0_33] : memref<16x256xf32, #tpu.memory_space<vmem>>, vector<16x256xf32>
    tpu.vector_store %arg14[%c0_32, %c0_33], %33 {strides = array<i32>} : memref<16x256xf32, #tpu.memory_space<vmem>>, vector<16x256xf32>,
    return
  }
  func.func @transform_0(%arg0: i32) -> (i32, i32) {
    %c0_i32 = arith.constant 0 : i32
    %c0_i32_0 = arith.constant 0 : i32
    return %c0_i32, %arg0 : i32, i32
  }
  func.func @transform_1(%arg0: i32) -> (i32, i32) {
    %c0_i32 = arith.constant 0 : i32
    %c0_i32_0 = arith.constant 0 : i32
    %c0_i32_1 = arith.constant 0 : i32
    return %c0_i32, %c0_i32_0 : i32, i32
  }
  func.func @transform_2(%arg0: i32) -> (i32, i32) {
    %c0_i32 = arith.constant 0 : i32
    %c0_i32_0 = arith.constant 0 : i32
    %c0_i32_1 = arith.constant 0 : i32
    return %c0_i32, %c0_i32_0 : i32, i32
  }
  func.func @transform_3(%arg0: i32) -> (i32, i32) {
    %c0_i32 = arith.constant 0 : i32
    %c0_i32_0 = arith.constant 0 : i32
    %c0_i32_1 = arith.constant 0 : i32
    return %c0_i32, %c0_i32_0 : i32, i32
  }
  func.func @transform_4(%arg0: i32) -> (i32, i32) {
    %c0_i32 = arith.constant 0 : i32
    %c0_i32_0 = arith.constant 0 : i32
    %c0_i32_1 = arith.constant 0 : i32
    return %c0_i32, %c0_i32_0 : i32, i32
  }
  func.func @transform_5(%arg0: i32) -> (i32, i32) {
    %c0_i32 = arith.constant 0 : i32
    %c0_i32_0 = arith.constant 0 : i32
    %c0_i32_1 = arith.constant 0 : i32
    return %c0_i32, %c0_i32_0 : i32, i32
  }
  func.func @transform_6(%arg0: i32) -> (i32, i32) {
    %c0_i32 = arith.constant 0 : i32
    %c0_i32_0 = arith.constant 0 : i32
    %c0_i32_1 = arith.constant 0 : i32
    return %c0_i32, %c0_i32_0 : i32, i32
  }
  func.func @transform_7(%arg0: i32) -> (i32, i32) {
    %c0_i32 = arith.constant 0 : i32
    %c0_i32_0 = arith.constant 0 : i32
    %c0_i32_1 = arith.constant 0 : i32
    return %c0_i32, %c0_i32_0 : i32, i32
  }
  func.func @transform_8(%arg0: i32) -> (i32, i32) {
    %c0_i32 = arith.constant 0 : i32
    %c0_i32_0 = arith.constant 0 : i32
    %c0_i32_1 = arith.constant 0 : i32
    return %c0_i32, %c0_i32_0 : i32, i32
  }
  func.func @transform_9(%arg0: i32) -> (i32, i32) {
    %c0_i32 = arith.constant 0 : i32
    %c0_i32_0 = arith.constant 0 : i32
    %c0_i32_1 = arith.constant 0 : i32
    return %c0_i32, %c0_i32_0 : i32, i32
  }
  func.func @transform_10(%arg0: i32) -> (i32, i32) {
    %c0_i32 = arith.constant 0 : i32
    %c0_i32_0 = arith.constant 0 : i32
    %c0_i32_1 = arith.constant 0 : i32
    return %c0_i32, %c0_i32_0 : i32, i32
  }
  func.func @transform_11(%arg0: i32) -> (i32, i32) {
    %c0_i32 = arith.constant 0 : i32
    %c0_i32_0 = arith.constant 0 : i32
    %c0_i32_1 = arith.constant 0 : i32
    return %c0_i32, %c0_i32_0 : i32, i32
  }
  func.func @transform_12(%arg0: i32) -> (i32, i32) {
    %c0_i32 = arith.constant 0 : i32
    %c0_i32_0 = arith.constant 0 : i32
    %c0_i32_1 = arith.constant 0 : i32
    return %c0_i32, %c0_i32_0 : i32, i32
  }
  func.func @transform_13(%arg0: i32) -> (i32, i32) {
    %c0_i32 = arith.constant 0 : i32
    %c0_i32_0 = arith.constant 0 : i32
    return %c0_i32, %arg0 : i32, i32
  }
  func.func @transform_14(%arg0: i32) -> (i32, i32) {
    %c0_i32 = arith.constant 0 : i32
    %c0_i32_0 = arith.constant 0 : i32
    return %c0_i32, %arg0 : i32, i32
  }
}

</mosaic_0001>

<bundles_post_ra>
// kernel: sae_forward.1
= control target key start
LH: loop header
LB: loop body
LE: loop exit
PB: predicated region body
PF: predicated region fallthrough
CT: control target
= control target key end

     0   :  { %s1883_s0 = inlined_call_operand.vmem [shape: f32[16,512], index: 0, kind: input, shape index: {}]   ;;  %s1884_s1 = inlined_call_operand.vmem [shape: f32[32,16], index: 1, kind: input, shape index: {}]   ;;  %s1885_s2 = inlined_call_operand.vmem [shape: f32[32,1], index: 2, kind: input, shape index: {}]   ;;  %s1886_s3 = inlined_call_operand.vmem [shape: f32[16,32], index: 3, kind: input, shape index: {}]   ;;  %s1887_s4 = inlined_call_operand.vmem [shape: f32[16,1], index: 4, kind: input, shape index: {}]   ;;  %s1888_s5 = inlined_call_operand.vmem [shape: f32[4,16], index: 5, kind: input, shape index: {}]   ;;  %s1889_s6 = inlined_call_operand.vmem [shape: f32[4,1], index: 6, kind: input, shape index: {}]   ;;  %s1890_s7 = inlined_call_operand.vmem [shape: f32[16,4], index: 7, kind: input, shape index: {}]   ;;  %s1891_s8 = inlined_call_operand.vmem [shape: f32[16,1], index: 8, kind: input, shape index: {}]   ;;  %s1892_s9 = inlined_call_operand.vmem [shape: f32[32,16], index: 9, kind: input, shape index: {}]   ;;  %s1893_s10 = inlined_call_operand.vmem [shape: f32[32,1], index: 10, kind: input, shape index: {}]   ;;  %s1894_s11 = inlined_call_operand.vmem [shape: f32[16,32], index: 11, kind: input, shape index: {}]   ;;  %s1895_s12 = inlined_call_operand.vmem [shape: f32[16,1], index: 12, kind: input, shape index: {}]   ;;  %s1896_s13 = inlined_call_operand.hbm [shape: f32[16,512], index: 13, kind: output, shape index: {0}]   ;;  %s1897_s14 = inlined_call_operand.hbm [shape: f32[4,512], index: 14, kind: output, shape index: {1}]  }
   0x1   :  { %1900 = sst [smem:[#allocation11_spill]] %s1883_s0 }
   0x2   :  { %1901 = sst [smem:[#allocation12_spill]] %s1884_s1 }
   0x3   :  { %1902 = sst [smem:[#allocation13_spill]] %s1885_s2 }
   0x4   :  { %1903 = sst [smem:[#allocation14_spill]] %s1886_s3 }
   0x5   :  { %20 = vsyncpa [#allocation4], 0 }
   0x6   :  { %22 = vsyncpa [#allocation4 + $0x1], 0 }
   0x7   :  { %23 = vsyncpa [#allocation6], 0 }
   0x8   :  { %25 = vsyncpa [#allocation6 + $0x1], 0  ;;  %s1621_s29 = smov 0   ;;  %s1623_s30 = smov 0  }
   0x9   :  { %s1625_s15 = smov 0   ;;  %s1627_s16 = smov 0  }
   0xa LB: > { %1904 = sst [smem:[#allocation9_spill]] %s1533_s15  ;;  %s1642_s17 = sadd.s32 4294967295, %s1537_s16   ;;  %s1537_s16 = sphi %s1627_s16, %s1917_s16   ;;  %s1533_s15 = sphi %s1625_s15, %s1914_s15   ;;  %s1529_s30 = sphi %s1623_s30, %s1916_s30   ;;  %s1525_s29 = sphi %s1621_s29, %s1915_s29  }
   0xb   : > { %s1302_s18 = sadd.s32 4294967294, %s1537_s16   ;;  %s1646_s19 = sadd.s32 1, %s1537_s16  }
   0xc   : > { %s38_s20 = sadd.s32 1, %s1533_s15  ;;  %s35_s21 = ssub.s32 %s1537_s16, %s1646_s19 }
   0xd   : > { %p45_p0 = scmp.ne.s32.totalorder %s1533_s15, %s1529_s30  ;;  %p36_p1 = scmp.eq.s32.totalorder %s35_s21, 0 }
   0xe   : > { %p46_p2 = scmp.eq.s32.totalorder %s1537_s16, 0  ;;  %p327_p3 = scmp.eq.s32.totalorder %s1642_s17, 1 }
   0xf   : > { %p332_p4 = scmp.ne.s32.totalorder %s1529_s30, %s1525_s29  ;;  %p333_p7 = scmp.eq.s32.totalorder %s1302_s18, 1 }
  0x10   : > { %s1658_s22 = scalar_select %p36_p1, %s1533_s15, %s38_s20  }
  0x11   : > { %p47_p5 = por %p46_p2, %p45_p0  ;;  %p1660_p6 = por %p327_p3, %p45_p0 }
  0x12   : > { %1905 = sst [smem:[#allocation10_spill]] %s1658_s22  ;;  %p1664_p8 = por %p333_p7, %p332_p4 }
  0x13   : > { %p1304_p9 = scmp.ge.s32.totalorder %s1537_s16, 2 }
  0x15   : > { %411 = sbr.rel (%p1304_p9) target bundleno = 40 (0x28), region = 64 }
  0x1c   : > { %414 = sbr.rel (!%p47_p5) target bundleno = 40 (0x28), region = 68  ;;  %s416_s25 = sand.u32 (%p47_p5), 1, %s1533_s15  }
  0x1d   : > { %s1337_s26 = sshll.u32 (%p47_p5), %s1537_s16, 4  ;;  %s1305_s27 = sshll.u32 (%p47_p5), %s416_s25, 5 }
  0x1e   : > { %s1908_s0 = sld [smem:[#allocation11_spill]] (%p47_p5)  ;;  %s418_s18 = scalar_lea.vmem (%p47_p5), [#allocation2], %s1305_s27 }
  0x24   : > { %s421_s21 = scalar_lea.vmem %s1908_s0, %s1337_s26 }
  0x25   : > { %v434_v0 = vld [vmem:[%s421_s21] sm:$0xff]  ;;  %v436_v1 = vld [vmem:[%s421_s21 + $0x8] sm:$0xff] }
  0x26   : > { %v438_v2 = vld [vmem:[%s421_s21 + $0x20] sm:$0xff]  ;;  %435 = vst [vmem:[%s418_s18] sm:$0xff] %v434_v0  ;;  %437 = vst [vmem:[%s418_s18 + $0x8] sm:$0xff] %v436_v1  ;;  %v440_v3 = vld [vmem:[%s421_s21 + $0x28] sm:$0xff] }
  0x27   : > { %439 = vst [vmem:[%s418_s18 + $0x10] sm:$0xff] %v438_v2  ;;  %441 = vst [vmem:[%s418_s18 + $0x18] sm:$0xff] %v440_v3 }
  0x28 PF: > { %p1308_p10 = scmp.ge.s32.totalorder %s1537_s16, 1  ;;  %p446_p11 = scmp.lt.s32.totalorder %s1537_s16, 3 }
  0x2a   : > { %p447_p12 = pnand %p1308_p10, %p446_p11 }
  0x2b   : > { %s1679_s25 = sand.u32 (!%p447_p12), 1, %s1529_s30   ;;  %v1539_v4 = vmov (!%p447_p12), 0.0   ;;  %s1909_s2 = sld [smem:[#allocation13_spill]] (!%p447_p12)  ;;  %v1540_v6 = vmov (!%p447_p12), 0   ;;  %vm538_vm0 = vcmask (!%p447_p12), 130048   ;;  %v642_v17 = vld [vmem:[%s1887_s4] sm:$0xff] (!%p447_p12) }
  0x2c   : > { %450 = sbr.rel (%p447_p12) target bundleno = 1445 (0x5a5), region = 91  ;;  %s1898_s26 = sshll.u32 (!%p447_p12), %s1679_s25, 5  ;;  %615 = vmatprep.mubr.f32.mxu0 (!%p447_p12), %v1539_v4  ;;  %725 = vmatprep.mubr.f32.mxu1 (!%p447_p12), %v1539_v4  ;;  %v643_v18 = vld [vmem:[%s1887_s4 + $0x8] sm:$0xff] (!%p447_p12)  ;;  %v743_v20 = vld [vmem:[%s1889_s6] sm:$0xf] (!%p447_p12)  ;;  %v937_v27 = vld [vmem:[%s1893_s10 + $0x10] sm:$0xff] (!%p447_p12) }
  0x2d   : > { %1417 = vset.pattern.permute.xlu0 (!%p447_p12), %v1540_v6  ;;  %1418 = vset.pattern.permute.xlu1 (!%p447_p12), %v1540_v6  ;;  %s455_s18 = scalar_lea.vmem (!%p447_p12), [#allocation2], %s1898_s26  ;;  %s1910_s1 = sld [smem:[#allocation12_spill]] (!%p447_p12)  ;;  %v830_v21 = vld [vmem:[%s1891_s8] sm:$0xff] (!%p447_p12)  ;;  %v831_v23 = vld [vmem:[%s1891_s8 + $0x8] sm:$0xff] (!%p447_p12)  ;;  %v938_v28 = vld [vmem:[%s1893_s10 + $0x18] sm:$0xff] (!%p447_p12)  ;;  %vm654_vm1 = vcmask (!%p447_p12), 261120  }
  0x2e   : > { %v507_v8 = vld [vmem:[%s455_s18 + $0x8] sm:$0xff] (!%p447_p12)  ;;  %v509_v9 = vld [vmem:[%s455_s18 + $0x18] sm:$0xff] (!%p447_p12)  ;;  %v506_v10 = vld [vmem:[%s455_s18] sm:$0xff] (!%p447_p12)  ;;  %s1911_s3 = sld [smem:[#allocation14_spill]] (!%p447_p12)  ;;  %s1311_s20 = sshll.u32 (!%p447_p12), %s1679_s25, 3  ;;  %vm849_vm2 = vcmask (!%p447_p12), 1043456  }
  0x2f   : > { %v1340_v11 = vpack.c.bf16 (!%p447_p12), %v509_v9, %v507_v8  ;;  %v508_v12 = vld [vmem:[%s455_s18 + $0x10] sm:$0xff] (!%p447_p12)  ;;  %v935_v24 = vld [vmem:[%s1893_s10] sm:$0xff] (!%p447_p12)  ;;  %v936_v26 = vld [vmem:[%s1893_s10 + $0x8] sm:$0xff] (!%p447_p12)  ;;  %vm842_vm3 = vcmask (!%p447_p12), 31744   ;;  %s1770_s21 = scalar_lea.vmem (!%p447_p12), [#allocation5], %s1311_s20  ;;  %s1339_s15 = sshll.u32 (!%p447_p12), %s1642_s17, 7 }
  0x30   : > { %v1342_v14 = vpack.c.bf16 (!%p447_p12), %v508_v12, %v506_v10  ;;  %v1070_v29 = vld [vmem:[%s1895_s12] sm:$0xff] (!%p447_p12)  ;;  %v1071_v30 = vld [vmem:[%s1895_s12 + $0x8] sm:$0xff] (!%p447_p12)  ;;  %s1810_s27 = scalar_lea.hbm (!%p447_p12), %s1897_s14, %s1339_s15  ;;  %s1175_s0 = scalar_lea.sflag (!%p447_p12), [#allocation6], %s1679_s25 }
  0x31   : > { %v514_v5 = vld [vmem:[%s1909_s2] sm:$0xff] (!%p447_p12)  ;;  %v516_v7 = vld [vmem:[%s1909_s2 + $0x10] sm:$0xff] (!%p447_p12)  ;;  %v515_v13 = vld [vmem:[%s1909_s2 + $0x8] sm:$0xff] (!%p447_p12)  ;;  %1341 = vmatprep.subr.bf16.mxu0 (!%p447_p12), %v1340_v11 }
  0x32   : > { %520 = vperm.xlu0 (!%p447_p12), %1417, %v514_v5   ;;  %530 = vperm.xlu1 (!%p447_p12), %1418, %v516_v7   ;;  %v517_v15 = vld [vmem:[%s1909_s2 + $0x18] sm:$0xff] (!%p447_p12)  ;;  %v742_v10 = vld [vmem:[%s1888_s5] sm:$0xf] (!%p447_p12)  ;;  %s1541_s2 = smov (!%p447_p12), [#allocation5]  }
  0x33   : > { %1343 = vmatpush1.bf16.msra.mxu0 %v1342_v14  ;;  %v510_v16 = vld [vmem:[%s1910_s1] sm:$0xff]  ;;  %v511_v19 = vld [vmem:[%s1910_s1 + $0x8] sm:$0xff]  ;;  %v512_v22 = vld [vmem:[%s1910_s1 + $0x10] sm:$0xff] }
  0x34   : > { %v513_v25 = vld [vmem:[%s1910_s1 + $0x18] sm:$0xff]  ;;  %v640_v55 = vld [vmem:[%s1911_s3] sm:$0xff]  ;;  %v641_v56 = vld [vmem:[%s1911_s3 + $0x8] sm:$0xff]  ;;  %s1205_s1 = sshll.u32 %s1770_s21, 4  ;;  %s1447_s3 = sshll.u32 %s1541_s2, 4  ;;  %s1206_s1 = int_to_ptr.vmem [resolvable:$true] %s1205_s1  ;;  %s1448_s3 = int_to_ptr.vmem [resolvable:$false] %s1447_s3 }
  0x35   : > { %s1443_s22 = scalar_lea.vmem %s1206_s1, 128  ;;  %s1449_s28 = scalar_lea.vmem %s1448_s3, 256 }
  0x36   : > { %525 = vperm.xlu0 %1417, %v515_v13   ;;  %535 = vperm.xlu1 %1418, %v517_v15   ;;  %p1444_p13 = scmp.ne.s32.totalorder %s1206_s1, %s1443_s22  ;;  %p1450_p2 = scmp.lt.s32.totalorder %s1206_s1, %s1448_s3 }
  0x37   : > { %1312 = vmatmul.mubr.msk.f32.vlgmr.msra.gmra.mrb[0].mxu0 %vm538_vm0, %v510_v16  ;;  %v828_v16 = vld [vmem:[%s1890_s7] sm:$0xff]  ;;  %p1451_p3 = scmp.lt.s32.totalorder %s1449_s28, %s1443_s22 }
  0x38   : > { %621 = vmatprep.mubr.f32.mxu0 %v1539_v4  ;;  %p1445_p0 = pnand %p1444_p13, %p1660_p6 }
  0x39   : > { %p1452_p4 = por %p1451_p3, %p1450_p2 }
  0x3a   : > { %646 = vperm.xlu0 %1417, %v642_v17   ;;  %651 = vperm.xlu1 %1418, %v643_v18   ;;  %v829_v18 = vld [vmem:[%s1890_s7 + $0x8] sm:$0xff]  ;;  %p1446_p1 = pneg %p1445_p0 }
  0x3b   : > { %1313 = vmatmul.mubr.msk.f32.gmra.mrb[2].mxu0 %vm538_vm0, %v511_v19 }
  0x3c   : > { %627 = vmatprep.mubr.f32.mxu0 %v1539_v4  ;;  %p1453_p5 = pnand %p1452_p4, %p1446_p1 }
  0x3e   : > { %746 = vperm.xlu0 %1417, %v743_v20   ;;  %834 = vperm.xlu1 %1418, %v830_v21  }
  0x3f   : > { %1314 = vmatmul.mubr.msk.f32.gmra.mrb[4].mxu0 %vm538_vm0, %v512_v22 }
  0x40   : > { %633 = vmatprep.mubr.f32.mxu0 %v1539_v4 }
  0x42   : > { %839 = vperm.xlu0 %1417, %v831_v23   ;;  %941 = vperm.xlu1 %1418, %v935_v24  }
  0x43   : > { %1315 = vmatmul.mubr.msk.f32.gmra.mrb[6].mxu0 %vm538_vm0, %v513_v25 }
  0x44   : > { %918 = vmatprep.mubr.f32.mxu0 %v1539_v4 }
  0x46   : > { %946 = vperm.xlu0 %1417, %v936_v26   ;;  %951 = vperm.xlu1 %1418, %v937_v27  }
  0x4a   : > { %956 = vperm.xlu0 %1417, %v938_v28   ;;  %1074 = vperm.xlu1 %1418, %v1070_v29  }
  0x4e   : > { %1079 = vperm.xlu0 %1417, %v1071_v30  }
  0xb1   : > { %v521_v31 = vpop.permute.xlu0 %520  ;;  %v531_v39 = vpop.permute.xlu1 %530 }
  0xb5   : > { %v526_v34 = vpop.permute.xlu0 %525  ;;  %v536_v46 = vpop.permute.xlu1 %535 }
  0xb9   : > { %v647_v57 = vpop.permute.xlu0 %646  ;;  %v652_v62 = vpop.permute.xlu1 %651 }
  0xbd   : > { %v747_v11 = vpop.permute.xlu0 %746  ;;  %v835_v21 = vpop.permute.xlu1 %834 }
  0xc1   : > { %v840_v22 = vpop.permute.xlu0 %839 }
 0x10a   : > { %v617_v32 = vpop.f32.mrb[0].mxu0 }
 0x10b   : > { %v619_v33 = vpop.f32.mrb[1].mxu0  ;;  %v618_v36 = vadd.f32 %v617_v32, %v521_v31  ;;  %v932_v32 = vld [vmem:[%s1892_s9 + $0x8] sm:$0xff] }
 0x10c   : > { %v620_v40 = vadd.f32 %v619_v33, %v521_v31  ;;  %v931_v31 = vld [vmem:[%s1892_s9] sm:$0xff]  ;;  %v933_v33 = vld [vmem:[%s1892_s9 + $0x10] sm:$0xff] }
 0x10e   : > { %v623_v35 = vpop.f32.mrb[2].mxu0 }
 0x10f   : > { %v624_v37 = vadd.f32 %v623_v35, %v526_v34  ;;  %v625_v38 = vpop.f32.mrb[3].mxu0  ;;  %v942_v35 = vpop.permute.xlu1 %941 }
 0x110   : > { %v626_v41 = vadd.f32 %v625_v38, %v526_v34  ;;  %v934_v34 = vld [vmem:[%s1892_s9 + $0x18] sm:$0xff] }
 0x111   : > { %v1346_v42 = vpack.c.bf16 %v624_v37, %v618_v36 }
 0x112   : > { %v629_v43 = vpop.f32.mrb[4].mxu0  ;;  %v1344_v44 = vpack.c.bf16 %v626_v41, %v620_v40  ;;  %v947_v40 = vpop.permute.xlu0 %946 }
 0x113   : > { %v631_v45 = vpop.f32.mrb[5].mxu0  ;;  %v630_v48 = vadd.f32 %v629_v43, %v531_v39 }
 0x114   : > { %1345 = vmatprep.subr.bf16.mxu1 %v1344_v44  ;;  %v632_v51 = vadd.f32 %v631_v45, %v531_v39  ;;  %v952_v45 = vpop.permute.xlu1 %951 }
 0x115   : > { %1347 = vmatpush1.bf16.msra.mxu1 %v1346_v42 }
 0x116   : > { %v635_v47 = vpop.f32.mrb[6].mxu0 }
 0x117   : > { %v636_v49 = vadd.f32 %v635_v47, %v536_v46  ;;  %v637_v50 = vpop.f32.mrb[7].mxu0 }
 0x118   : > { %v638_v52 = vadd.f32 %v637_v50, %v536_v46  ;;  %v957_v50 = vpop.permute.xlu0 %956 }
 0x119   : > { %v1350_v53 = vpack.c.bf16 %v636_v49, %v630_v48 }
 0x11a   : > { %v1348_v54 = vpack.c.bf16 %v638_v52, %v632_v51 }
 0x11c   : > { %1349 = vmatprep.subr.bf16.mxu1 %v1348_v54 }
 0x11d   : > { %1351 = vmatpush1.bf16.msra.mxu1 %v1350_v53 }
 0x120   : > { %1316 = vmatmul.mubr.msk.f32.vlgmr.msra.gmra.mrb[0].mxu1 %vm654_vm1, %v640_v55 }
 0x121   : > { %731 = vmatprep.mubr.f32.mxu1 %v1539_v4 }
 0x124   : > { %1317 = vmatmul.mubr.msk.f32.gmra.mrb[2].mxu1 %vm654_vm1, %v641_v56 }
 0x125   : > { %816 = vmatprep.mubr.f32.mxu1 %v1539_v4 }
 0x1f3   : > { %v727_v58 = vpop.f32.mrb[0].mxu1 }
 0x1f4   : > { %v728_v59 = vadd.f32 %v727_v58, %v647_v57  ;;  %v729_v60 = vpop.f32.mrb[1].mxu1 }
 0x1f5   : > { %v730_v61 = vadd.f32 %v729_v60, %v647_v57 }
 0x1f6   : > { %1419 = vtanh.f32 %v728_v59 }
 0x1f7   : > { %v733_v63 = vpop.f32.mrb[2].mxu1  ;;  %1421 = vtanh.f32 %v730_v61 }
 0x1f8   : > { %v734_v0 = vadd.f32 %v733_v63, %v652_v62  ;;  %v735_v1 = vpop.f32.mrb[3].mxu1 }
 0x1f9   : > { %v736_v2 = vadd.f32 %v735_v1, %v652_v62 }
 0x1fa   : > { %1423 = vtanh.f32 %v734_v0 }
 0x1fb   : > { %1425 = vtanh.f32 %v736_v2 }
 0x200   : > { %v1420_v3 = vpop.eup %1419 }
 0x201   : > { %v1422_v5 = vpop.eup %1421 }
 0x204   : > { %v1424_v6 = vpop.eup %1423 }
 0x205   : > { %v1426_v7 = vpop.eup %1425  ;;  %v1354_v8 = vpack.c.bf16 %v1424_v6, %v1420_v3  ;;  %v1068_v3 = vld [vmem:[%s1894_s11] sm:$0xff] }
 0x206   : > { %v1352_v9 = vpack.c.bf16 %v1426_v7, %v1422_v5  ;;  %v1069_v5 = vld [vmem:[%s1894_s11 + $0x8] sm:$0xff] }
 0x208   : > { %1353 = vmatprep.subr.bf16.mxu1 %v1352_v9 }
 0x209   : > { %1355 = vmatpush1.bf16.msra.mxu1 %v1354_v8 }
 0x20c   : > { %1318 = vmatmul.mubr.msk.f32.vlgmr.msra.gmra.mrb[4].mxu1 %vm538_vm0, %v742_v10 }
 0x20d   : > { %1035 = vmatprep.mubr.f32.mxu1 %v1539_v4 }
 0x2df   : > { %v818_v12 = vpop.f32.mrb[4].mxu1 }
 0x2e0   : > { %v819_v13 = vadd.f32 %v818_v12, %v747_v11  ;;  %v820_v14 = vpop.f32.mrb[5].mxu1 }
 0x2e1   : > { %v821_v15 = vadd.f32 %v820_v14, %v747_v11 }
 0x2e3   : > { %v825_v17 = vcombine.low %v819_v13, %v821_v15  ;;  %1319 = vmatprep.subr.msk.mxu0 %vm849_vm2, %v821_v15 }
 0x2e4   : > { %1320 = vmatpush1.msk.msra.mxu0 %vm849_vm2, %v819_v13 }
 0x2e5   : > { %1321 = vmatmul.mubr.msk.f32.vlgmr.msra.gmra.mrb[8].mxu0 %vm842_vm3, %v828_v16  ;;  %827 = vst [vmem:[%s1770_s21] sm:$0xff] %v825_v17 }
 0x2e6   : > { %924 = vmatprep.mubr.f32.mxu0 %v1539_v4 }
 0x2e9   : > { %1322 = vmatmul.mubr.msk.f32.gmra.mrb[10].mxu0 %vm842_vm3, %v829_v18 }
 0x2ea   : > { %1152 = vmatprep.mubr.f32.mxu0 %v1539_v4 }
 0x3b8   : > { %v920_v19 = vpop.f32.mrb[8].mxu0 }
 0x3b9   : > { %v922_v20 = vpop.f32.mrb[9].mxu0  ;;  %v921_v24 = vadd.f32 %v920_v19, %v835_v21 }
 0x3ba   : > { %v923_v27 = vadd.f32 %v922_v20, %v835_v21 }
 0x3bc   : > { %v926_v23 = vpop.f32.mrb[10].mxu0 }
 0x3bd   : > { %v927_v25 = vadd.f32 %v926_v23, %v840_v22  ;;  %v928_v26 = vpop.f32.mrb[11].mxu0 }
 0x3be   : > { %v929_v28 = vadd.f32 %v928_v26, %v840_v22 }
 0x3bf   : > { %v1358_v29 = vpack.c.bf16 %v927_v25, %v921_v24 }
 0x3c0   : > { %v1356_v30 = vpack.c.bf16 %v929_v28, %v923_v27 }
 0x3c2   : > { %1357 = vmatprep.subr.bf16.mxu1 %v1356_v30 }
 0x3c3   : > { %1359 = vmatpush1.bf16.msra.mxu1 %v1358_v29 }
 0x3c6   : > { %1323 = vmatmul.mubr.msk.f32.vlgmr.msra.gmra.mrb[6].mxu1 %vm538_vm0, %v931_v31 }
 0x3c7   : > { %1041 = vmatprep.mubr.f32.mxu1 %v1539_v4 }
 0x3ca   : > { %1324 = vmatmul.mubr.msk.f32.gmra.mrb[8].mxu1 %vm538_vm0, %v932_v32 }
 0x3cb   : > { %1047 = vmatprep.mubr.f32.mxu1 %v1539_v4 }
 0x3ce   : > { %1325 = vmatmul.mubr.msk.f32.gmra.mrb[10].mxu1 %vm538_vm0, %v933_v33 }
 0x3cf   : > { %1053 = vmatprep.mubr.f32.mxu1 %v1539_v4 }
 0x3d2   : > { %1326 = vmatmul.mubr.msk.f32.gmra.mrb[12].mxu1 %vm538_vm0, %v934_v34 }
 0x499   : > { %v1037_v36 = vpop.f32.mrb[6].mxu1 }
 0x49a   : > { %v1038_v37 = vadd.f32 %v1037_v36, %v942_v35  ;;  %v1039_v38 = vpop.f32.mrb[7].mxu1 }
 0x49b   : > { %v1040_v39 = vadd.f32 %v1039_v38, %v942_v35 }
 0x49c   : > { %1427 = vtanh.f32 %v1038_v37 }
 0x49d   : > { %v1043_v41 = vpop.f32.mrb[8].mxu1  ;;  %1429 = vtanh.f32 %v1040_v39 }
 0x49e   : > { %v1044_v42 = vadd.f32 %v1043_v41, %v947_v40  ;;  %v1045_v43 = vpop.f32.mrb[9].mxu1 }
 0x49f   : > { %v1046_v44 = vadd.f32 %v1045_v43, %v947_v40 }
 0x4a0   : > { %1431 = vtanh.f32 %v1044_v42 }
 0x4a1   : > { %1433 = vtanh.f32 %v1046_v44  ;;  %v1049_v46 = vpop.f32.mrb[10].mxu1 }
 0x4a2   : > { %v1050_v47 = vadd.f32 %v1049_v46, %v952_v45  ;;  %v1051_v48 = vpop.f32.mrb[11].mxu1 }
 0x4a3   : > { %v1052_v49 = vadd.f32 %v1051_v48, %v952_v45 }
 0x4a4   : > { %1435 = vtanh.f32 %v1050_v47 }
 0x4a5   : > { %v1055_v51 = vpop.f32.mrb[12].mxu1  ;;  %1437 = vtanh.f32 %v1052_v49 }
 0x4a6   : > { %v1056_v52 = vadd.f32 %v1055_v51, %v957_v50  ;;  %v1057_v53 = vpop.f32.mrb[13].mxu1  ;;  %v1428_v55 = vpop.eup %1427 }
 0x4a7   : > { %v1058_v54 = vadd.f32 %v1057_v53, %v957_v50  ;;  %v1430_v56 = vpop.eup %1429 }
 0x4a8   : > { %1439 = vtanh.f32 %v1056_v52 }
 0x4a9   : > { %1441 = vtanh.f32 %v1058_v54 }
 0x4aa   : > { %v1432_v57 = vpop.eup %1431 }
 0x4ab   : > { %v1434_v58 = vpop.eup %1433  ;;  %v1362_v59 = vpack.c.bf16 %v1432_v57, %v1428_v55 }
 0x4ac   : > { %v1360_v60 = vpack.c.bf16 %v1434_v58, %v1430_v56 }
 0x4ae   : > { %1361 = vmatprep.subr.bf16.mxu0 %v1360_v60  ;;  %v1436_v61 = vpop.eup %1435 }
 0x4af   : > { %1363 = vmatpush1.bf16.msra.mxu0 %v1362_v59  ;;  %v1438_v62 = vpop.eup %1437 }
 0x4b2   : > { %v1440_v63 = vpop.eup %1439 }
 0x4b3   : > { %v1442_v0 = vpop.eup %1441  ;;  %v1366_v1 = vpack.c.bf16 %v1440_v63, %v1436_v61 }
 0x4b4   : > { %v1364_v2 = vpack.c.bf16 %v1442_v0, %v1438_v62 }
 0x4b6   : > { %1365 = vmatprep.subr.bf16.mxu0 %v1364_v2 }
 0x4b7   : > { %1367 = vmatpush1.bf16.msra.mxu0 %v1366_v1 }
 0x4ba   : > { %1327 = vmatmul.mubr.msk.f32.vlgmr.msra.gmra.mrb[12].mxu0 %vm654_vm1, %v1068_v3 }
 0x4bb   : > { %1158 = vmatprep.mubr.f32.mxu0 %v1539_v4 }
 0x4be   : > { %1328 = vmatmul.mubr.msk.f32.gmra.mrb[14].mxu0 %vm654_vm1, %v1069_v5 }
 0x4bf   : > { %1456 = shalt.err (!%p1453_p5)
}
 0x4c0   : > { %s1457_s21 = scalar_lea.hbm %s1810_s27, 128  ;;  %s1461_s2 = scalar_lea.hbm %s1897_s14, 256 }
 0x4c1   : > { %p1458_p7 = scmp.ne.s32.totalorder %s1810_s27, %s1457_s21  ;;  %p1462_p12 = scmp.lt.u32.totalorder %s1810_s27, %s1897_s14 }
 0x4c2   : > { %p1463_p13 = scmp.lt.u32.totalorder %s1461_s2, %s1457_s21  ;;  %p1465_p1 = scmp.lt.u32.totalorder %s1457_s21, %s1810_s27 }
 0x4c3   : > { %p1459_p10 = pnand %p1458_p7, %p1660_p6 }
 0x4c4   : > { %p1464_p0 = por %p1463_p13, %p1462_p12 }
 0x4c5   : > { %p1460_p11 = pneg %p1459_p10 }
 0x4c6   : > { %p1466_p2 = por %p1465_p1, %p1464_p0 }
 0x4c8   : > { %p1467_p3 = pnand %p1466_p2, %p1460_p11 }
 0x4ca   : > { %1470 = shalt.err (!%p1467_p3)
}
 0x4cb   : > { %1369 = dma.vmem_to_hbm [thread:$0]  (%p1660_p6), %s1206_s1, 128, %s1810_s27, %s1175_s0   ;;  %v1075_v4 = vpop.permute.xlu1 %1074  ;;  %v1080_v10 = vpop.permute.xlu0 %1079 }
 0x4cc   : > { %s1912_s18 = sshll.u32 %s1679_s25, 5  ;;  %s1338_s21 = sshll.u32 %s1642_s17, 8 }
 0x4cd   : > { %s495_s22 = scalar_lea.vmem [#allocation3], %s1912_s18  ;;  %s1839_s0 = scalar_lea.hbm %s1896_s13, %s1338_s21 }
 0x4ce   : > { %s1188_s28 = sshll.u32 %s495_s22, 4  ;;  %s1170_s17 = scalar_lea.sflag [#allocation4], %s1679_s25  ;;  %s1834_s28 = int_to_ptr.vmem [resolvable:$true] %s1188_s28 }
 0x4cf   : > { %s1471_s20 = scalar_lea.vmem %s1834_s28, 512  ;;  %s1542_s15 = smov [#allocation3]  }
 0x4d0   : > { %p1472_p4 = scmp.ne.s32.totalorder %s1834_s28, %s1471_s20  ;;  %s1475_s2 = sshll.u32 %s1542_s15, 4  ;;  %s1476_s2 = int_to_ptr.vmem [resolvable:$false] %s1475_s2 }
 0x4d1   : > { %s1477_s26 = scalar_lea.vmem %s1476_s2, 1024  ;;  %p1478_p10 = scmp.lt.s32.totalorder %s1834_s28, %s1476_s2 }
 0x4d2   : > { %p1473_p5 = pnand %p1472_p4, %p1660_p6  ;;  %p1479_p11 = scmp.lt.s32.totalorder %s1477_s26, %s1471_s20 }
 0x4d4   : > { %p1474_p7 = pneg %p1473_p5  ;;  %p1480_p12 = por %p1479_p11, %p1478_p10 }
 0x4d6   : > { %p1481_p13 = pnand %p1480_p12, %p1474_p7 }
 0x58d   : > { %v1154_v6 = vpop.f32.mrb[12].mxu0 }
 0x58e   : > { %v1155_v7 = vadd.f32 %v1154_v6, %v1075_v4  ;;  %v1156_v8 = vpop.f32.mrb[13].mxu0 }
 0x58f   : > { %v1157_v9 = vadd.f32 %v1156_v8, %v1075_v4 }
 0x590   : > { %1165 = vst [vmem:[%s495_s22] sm:$0xff] %v1155_v7 }
 0x591   : > { %1166 = vst [vmem:[%s495_s22 + $0x8] sm:$0xff] %v1157_v9  ;;  %v1160_v11 = vpop.f32.mrb[14].mxu0 }
 0x592   : > { %v1161_v12 = vadd.f32 %v1160_v11, %v1080_v10  ;;  %v1162_v13 = vpop.f32.mrb[15].mxu0 }
 0x593   : > { %v1163_v14 = vadd.f32 %v1162_v13, %v1080_v10 }
 0x594   : > { %1167 = vst [vmem:[%s495_s22 + $0x10] sm:$0xff] %v1161_v12 }
 0x595   : > { %1168 = vst [vmem:[%s495_s22 + $0x18] sm:$0xff] %v1163_v14 }
 0x596   : > { %1484 = shalt.err (!%p1481_p13)
}
 0x597   : > { %s1485_s3 = scalar_lea.hbm %s1839_s0, 512  ;;  %s1489_s21 = scalar_lea.hbm %s1896_s13, 1024 }
 0x598   : > { %p1486_p0 = scmp.ne.s32.totalorder %s1839_s0, %s1485_s3  ;;  %p1490_p3 = scmp.lt.u32.totalorder %s1839_s0, %s1896_s13 }
 0x599   : > { %p1491_p4 = scmp.lt.u32.totalorder %s1489_s21, %s1485_s3  ;;  %p1493_p7 = scmp.lt.u32.totalorder %s1485_s3, %s1839_s0 }
 0x59a   : > { %p1487_p1 = pnand %p1486_p0, %p1660_p6 }
 0x59b   : > { %p1492_p5 = por %p1491_p4, %p1490_p3 }
 0x59c   : > { %p1488_p2 = pneg %p1487_p1 }
 0x59d   : > { %p1494_p10 = por %p1493_p7, %p1492_p5 }
 0x59f   : > { %p1495_p11 = pnand %p1494_p10, %p1488_p2 }
 0x5a1   : > { %1498 = shalt.err (!%p1495_p11)
}
 0x5a2   : > { %s1543_s20 = smov 256   ;;  %s1544_s15 = smov 512  }
 0x5a3   : > { %s1545_s2 = smov 16  }
 0x5a4   : > { %1368 = dma.vmem_to_hbm [thread:$0]  (%p1660_p6), %s1834_s28, 512, %s1839_s0, %s1170_s17, %s1543_s20, %s1544_s15, %s1545_s2  }
 0x5a5 PF: > { %s1217_s26 = sand.u32 1, %s1525_s29   ;;  %p1373_p12 = pnand %p1304_p9, %p1664_p8 }
 0x5a6   : > { %s1218_s3 = scalar_lea.sflag [#allocation4], %s1217_s26 }
 0x5a7   : > { %1516 = dma.done.wait (!%p1373_p12), %s1218_s3, 512  }
 0x5a8   : > { %1518 = vsyncadd (!%p1373_p12), %s1218_s3, 4294966784  ;;  %s1227_s18 = scalar_lea.sflag [#allocation6], %s1217_s26 }
 0x5a9   : > { %1520 = dma.done.wait (!%p1373_p12), %s1227_s18, 128  }
 0x5aa   : > { %1522 = vsyncadd (!%p1373_p12), %s1227_s18, 4294967168  ;;  %s1913_s22 = sld [smem:[#allocation9_spill]]  ;;  %s1914_s15 = sld [smem:[#allocation10_spill]] }
 0x5ab   : > { %p28_p6 = scmp.ge.s32.totalorder %s1646_s19, 4   ;;  %s1915_s29 = smov %s1529_s30 }
 0x5ac   : > { %s1917_s16 = smov %s1646_s19 }
 0x5ad   :  { %30 = sbr.rel (!%p28_p6) target bundleno = 10 (0xa), region = 152 }
 0x5b0   : > { %s1916_s30 = smov %s1913_s22 }
 0x5b4   :  { %1232 = vsyncpa [#allocation4], 1 }
 0x5b5   :  { %1234 = vsyncpa [#allocation4 + $0x1], 1 }
 0x5b6   :  { %1235 = vsyncpa [#allocation6], 1 }
 0x5b7   :  { %1237 = vsyncpa [#allocation6 + $0x1], 1 }

</bundles_post_ra>
